<compile_context>
chip_gen: v5e
topology: v5e:2x2
jax: 0.10.0
libtpu: 0.0.40
codegen_flags: <defaults>
</compile_context>

<pallas_src>
import math
from functools import partial

import jax
import jax.numpy as jnp
from jax.experimental import pallas as pl
from jax.experimental.pallas import tpu as pltpu

# ---- model hyper-parameters (module defaults) -------------------------------
D = 4            # theta_dim
L = 8            # x_dim
CTX = L + D      # flow context dim: cat(x, b)
H = 64           # MaskedMLP hidden width (zuko default)
T = 3            # number of MAF transforms (zuko default)
LOG2PI = math.log(2.0 * math.pi)
SLOPE_BOUND = -math.log(1e-3)    # soft-clip bound for log-scale (zuko slope=1e-3)


def _round_up(n, m):
    return (n + m - 1) // m * m


# ----------------------------- Pallas kernel ---------------------------------
def amnpe_kernel(inpT_ref, wc_ref, b1_ref, wt_ref, w2_ref, b2_ref,
                 w3_ref, b3_ref, out_ref):
    """One batch tile (features x batch layout; batch lives on the lanes).

    inpT_ref : (D+CTX, tb) f32   rows [0:D) = theta, rows [D:) = cat(x, 2b-1)
    wc_ref   : (T*H, D+CTX) bf16 fused first-layer weights (theta cols live
                                  only for t=0, zero for t=1,2)
    b1_ref   : (T*H, 1)  f32
    wt_ref   : ((T-1)*H, D) bf16 first-layer theta weights for t=1,2
    w2_ref   : (T*H, H)  bf16
    b2_ref   : (T*H, 1)  f32
    w3_ref   : (T, 2D, H) bf16   fused [shift; scale] output heads
    b3_ref   : (T, 2D, 1) f32
    out_ref  : (1, tb)   f32     lane-dense log-density row
    """
    inp = inpT_ref[...]                       # (D+CTX, tb) f32
    inp_bf = inp.astype(jnp.bfloat16)
    zT = inp[:D, :]                           # (D, tb) f32 flow variable (= theta)

    # Fused first-layer matmul for all T transforms in one MXU pass.
    ctx_pre = (jnp.dot(wc_ref[...], inp_bf,
                       preferred_element_type=jnp.float32)
               + b1_ref[...])                 # (T*H, tb) f32

    ladj = jnp.zeros_like(zT)                 # (D, tb) per-dim log|det| accumulator

    for t in range(T):                        # static unroll over transforms
        h = ctx_pre[t * H:(t + 1) * H, :]
        if t > 0:
            # TODO(synk): review suggests moving this K=4 matmul to 4 VPU FMAs
            # if a bundle dump shows the MXU push/pop slot saturating; kept on
            # the MXU pending that measurement.
            h = h + jnp.dot(wt_ref[(t - 1) * H:t * H, :],
                            zT.astype(jnp.bfloat16),
                            preferred_element_type=jnp.float32)
        h = jnp.maximum(h, 0.0)
        h = (jnp.dot(w2_ref[t * H:(t + 1) * H, :], h.astype(jnp.bfloat16),
                     preferred_element_type=jnp.float32)
             + b2_ref[t * H:(t + 1) * H, :])
        h = jnp.maximum(h, 0.0)
        ss = (jnp.dot(w3_ref[t], h.astype(jnp.bfloat16),
                      preferred_element_type=jnp.float32)
              + b3_ref[t])                    # (2D, tb)

        shift = ss[:D, :]
        scale = ss[D:, :]

        # MonotonicAffineTransform: soft-clipped log-scale (divide on the EUP),
        # z * exp(ls) + shift, all in f32.
        log_scale = scale * pl.reciprocal(
            1.0 + jnp.abs(scale) * (1.0 / SLOPE_BOUND), approx=True)
        zT = zT * jnp.exp(log_scale) + shift
        ladj = ladj + log_scale

    # standard-normal base log-density + accumulated log|det|  -> (1, tb)
    logp = (jnp.sum(ladj - 0.5 * zT * zT, axis=0, keepdims=True)
            - 0.5 * D * LOG2PI)
    out_ref[...] = logp


# ----------------------------- glue / parameters -----------------------------
def _made_masks(order):
    """Standard MADE degree masks; context inputs (degree -1) feed everything."""
    deg_in = jnp.concatenate(
        [order, -jnp.ones((CTX,), jnp.int32)])            # (D+CTX,)
    deg_h = (jnp.arange(H, dtype=jnp.int32) % D) - 1      # cycle {-1,...,D-2}
    m1 = (deg_h[None, :] >= deg_in[:, None]).astype(jnp.float32)  # (D+CTX, H)
    m2 = (deg_h[None, :] >= deg_h[:, None]).astype(jnp.float32)   # (H, H)
    m3 = (order[None, :] > deg_h[:, None]).astype(jnp.float32)    # (H, D)
    return m1, m2, m3


def init_params(key):
    """Deterministic synthetic weights (torch.nn.Linear-style uniform init),
    pre-multiplied by the autoregressive masks and stored in the kernel's
    transposed / fused layout. MXU operands in bf16, biases in f32."""
    wc_rows, b1_rows = [], []
    wt_rows, w2_rows, b2_rows, w3_rows, b3_rows = [], [], [], [], []
    for t in range(T):
        # zuko MAF alternates identity / reversed orders
        order = (jnp.arange(D, dtype=jnp.int32) if t % 2 == 0
                 else jnp.arange(D - 1, -1, -1, dtype=jnp.int32))
        m1, m2, m3 = _made_masks(order)
        key, *ks = jax.random.split(key, 9)
        s1, s2, s3 = 1.0 / math.sqrt(D + CTX), 1.0 / math.sqrt(H), 1.0 / math.sqrt(H)

        W1 = jax.random.uniform(ks[0], (D + CTX, H), jnp.float32, -s1, s1) * m1
        if t == 0:
            # t=0 conditions on z == theta, which is in the input stream, so
            # its theta columns fold straight into the fused context matmul.
            wc_rows.append(W1.T)                                   # (H, D+CTX)
        else:
            wc_rows.append(jnp.concatenate(
                [jnp.zeros((H, D), jnp.float32), W1[D:].T], axis=1))
            wt_rows.append(W1[:D].T)                               # (H, D)
        b1_rows.append(jax.random.uniform(ks[1], (H,), jnp.float32, -s1, s1))

        W2 = jax.random.uniform(ks[2], (H, H), jnp.float32, -s2, s2) * m2
        w2_rows.append(W2.T)                                       # (H, H)
        b2_rows.append(jax.random.uniform(ks[3], (H,), jnp.float32, -s2, s2))

        W3s = jax.random.uniform(ks[4], (H, D), jnp.float32, -s3, s3) * m3
        b3s = jax.random.uniform(ks[5], (D,), jnp.float32, -s3, s3)
        W3g = jax.random.uniform(ks[6], (H, D), jnp.float32, -s3, s3) * m3
        b3g = jax.random.uniform(ks[7], (D,), jnp.float32, -s3, s3)
        w3_rows.append(jnp.concatenate([W3s.T, W3g.T], axis=0))    # (2D, H)
        b3_rows.append(jnp.concatenate([b3s, b3g], axis=0))        # (2D,)

    wc = jnp.concatenate(wc_rows, axis=0).astype(jnp.bfloat16)     # (T*H, D+CTX)
    b1 = jnp.concatenate(b1_rows, axis=0)[:, None]                 # (T*H, 1) f32
    wt = jnp.concatenate(wt_rows, axis=0).astype(jnp.bfloat16)     # ((T-1)*H, D)
    w2 = jnp.concatenate(w2_rows, axis=0).astype(jnp.bfloat16)     # (T*H, H)
    b2 = jnp.concatenate(b2_rows, axis=0)[:, None]                 # (T*H, 1) f32
    w3 = jnp.stack(w3_rows, axis=0).astype(jnp.bfloat16)           # (T, 2D, H)
    b3 = jnp.stack(b3_rows, axis=0)[:, :, None]                    # (T, 2D, 1) f32
    return wc, b1, wt, w2, b2, w3, b3


@partial(jax.jit, static_argnames=("tb",))
def amnpe_log_prob(params, theta, x, b, *, tb=2048):
    """AMNPE.forward: returns log p(theta | x, b) with shape (*,)."""
    bf = b.astype(jnp.float32) * 2.0 - 1.0          # BoolTensor -> {-1, +1}
    # broadcast(theta, x, b, ignore=1): broadcast leading batch dims
    batch = jnp.broadcast_shapes(theta.shape[:-1], x.shape[:-1], bf.shape[:-1])
    theta = jnp.broadcast_to(theta, batch + (D,)).astype(jnp.float32)
    x = jnp.broadcast_to(x, batch + (L,)).astype(jnp.float32)
    bf = jnp.broadcast_to(bf, batch + (D,))

    # Single fused input stream: [theta | x | 2b-1] per sample.
    inp2 = jnp.concatenate([theta, x, bf], axis=-1).reshape(-1, D + CTX)
    B = inp2.shape[0]

    # Batch tile: multiple of 128 lanes, default 2048; shrunk for small B and
    # capped so B >= 256 always yields >= 2 grid steps (v7x has 2 TensorCores
    # fed by the "parallel" grid axis).
    tb = _round_up(max(tb, 128), 128)
    if B >= 256:
        tb_eff = min(tb, _round_up(-(-B // 2), 128))
    else:
        tb_eff = min(tb, _round_up(B, 128))
    Bpad = _round_up(B, tb_eff)
    grid = (Bpad // tb_eff,)

    # Pad + transpose so batch lives on the lane dimension inside the kernel
    # (fused with the pallas_call by jit; no separate HBM round trip).
    inpT = jnp.pad(inp2, ((0, Bpad - B), (0, 0))).T      # (D+CTX, Bpad)

    flops_per_sample = (2 * (T * H) * (D + CTX)
                        + (T - 1) * 2 * H * D
                        + T * (2 * H * H + 2 * (2 * D) * H))
    weight_bytes = (2 * (T * H * (D + CTX) + (T - 1) * H * D
                         + T * H * H + T * 2 * D * H)
                    + 4 * (T * H + T * H + T * 2 * D))
    cost = pl.CostEstimate(
        flops=Bpad * flops_per_sample,
        transcendentals=Bpad * 2 * T * D,
        bytes_accessed=4 * Bpad * (D + CTX + 1) + grid[0] * weight_bytes,
    )

    cp_kwargs = dict(dimension_semantics=("parallel",))
    if tb_eff >= 4096:
        # Working set (ctx_pre, activations, double-buffered I/O) grows
        # linearly with tb; v5e's scoped-VMEM default is only 16 MiB.
        cp_kwargs["vmem_limit_bytes"] = 64 * 1024 * 1024

    out = pl.pallas_call(
        amnpe_kernel,
        out_shape=jax.ShapeDtypeStruct((1, Bpad), jnp.float32),
        grid_spec=pltpu.PrefetchScalarGridSpec(
            num_scalar_prefetch=0,
            grid=grid,
            in_specs=[
                pl.BlockSpec((D + CTX, tb_eff), lambda i: (0, i)),   # [theta|ctx]^T
                pl.BlockSpec((T * H, D + CTX), lambda i: (0, 0)),    # fused W1
                pl.BlockSpec((T * H, 1), lambda i: (0, 0)),          # b1
                pl.BlockSpec(((T - 1) * H, D), lambda i: (0, 0)),    # wt (t=1,2)
                pl.BlockSpec((T * H, H), lambda i: (0, 0)),          # W2 stacked
                pl.BlockSpec((T * H, 1), lambda i: (0, 0)),          # b2
                pl.BlockSpec((T, 2 * D, H), lambda i: (0, 0, 0)),    # W3 [shift;scale]
                pl.BlockSpec((T, 2 * D, 1), lambda i: (0, 0, 0)),    # b3
            ],
            out_specs=pl.BlockSpec((1, tb_eff), lambda i: (0, i)),   # lane-dense out
        ),
        compiler_params=pltpu.CompilerParams(**cp_kwargs),
        cost_estimate=cost,
    )(inpT, *params)

    return out[0, :B].reshape(batch)


# ------------------------- pure-JAX reference (check) -------------------------
def amnpe_log_prob_ref(params, theta, x, b):
    """Plain f32 reference of the same flow (kernel uses bf16 MXU operands)."""
    wc, b1, wt, w2, b2, w3, b3 = params
    wc = wc.astype(jnp.float32)
    wt = wt.astype(jnp.float32)
    w2 = w2.astype(jnp.float32)
    w3 = w3.astype(jnp.float32)

    bf = b.astype(jnp.float32) * 2.0 - 1.0
    inp = jnp.concatenate([theta.astype(jnp.float32),
                           x.astype(jnp.float32), bf], axis=-1)   # (B, D+CTX)
    z = theta.astype(jnp.float32)
    ladj = jnp.zeros(z.shape[:-1], jnp.float32)
    for t in range(T):
        pre = inp @ wc[t * H:(t + 1) * H].T + b1[t * H:(t + 1) * H, 0]
        if t > 0:
            pre = pre + z @ wt[(t - 1) * H:t * H].T
        h = jnp.maximum(pre, 0.0)
        h = jnp.maximum(h @ w2[t * H:(t + 1) * H].T + b2[t * H:(t + 1) * H, 0], 0.0)
        ss = h @ w3[t].T + b3[t, :, 0]
        shift, scale = ss[:, :D], ss[:, D:]
        ls = scale / (1.0 + jnp.abs(scale) / SLOPE_BOUND)
        z = z * jnp.exp(ls) + shift
        ladj = ladj + jnp.sum(ls, axis=-1)
    return ladj - 0.5 * jnp.sum(z * z, axis=-1) - 0.5 * D * LOG2PI


# ----------------------------------- main -------------------------------------
if __name__ == "__main__":
    key = jax.random.PRNGKey(0)
    kp, kt, kx, kb = jax.random.split(key, 4)

    params = init_params(kp)

    # small-batch path (single grid step)
    B = 16
    theta = jax.random.normal(kt, (B, D), jnp.float32)
    x = jax.random.normal(kx, (B, L), jnp.float32)
    b = jax.random.bernoulli(kb, 0.5, (B, D))        # boolean marginal mask

    logp = jax.block_until_ready(amnpe_log_prob(params, theta, x, b))
    assert logp.shape == (B,), logp.shape
    assert bool(jnp.all(jnp.isfinite(logp)))
    ref = amnpe_log_prob_ref(params, theta, x, b)
    assert jnp.allclose(logp, ref, rtol=5e-2, atol=1e-1), (logp, ref)

    # larger batch: exercises the >=2-step grid path (v7x TensorCore split)
    B2 = 300
    k2a, k2b, k2c = jax.random.split(kb, 3)
    theta2 = jax.random.normal(k2a, (B2, D), jnp.float32)
    x2 = jax.random.normal(k2b, (B2, L), jnp.float32)
    b2 = jax.random.bernoulli(k2c, 0.5, (B2, D))
    logp2 = jax.block_until_ready(amnpe_log_prob(params, theta2, x2, b2))
    assert logp2.shape == (B2,)
    assert bool(jnp.all(jnp.isfinite(logp2)))
    ref2 = amnpe_log_prob_ref(params, theta2, x2, b2)
    assert jnp.allclose(logp2, ref2, rtol=5e-2, atol=1e-1)

    # TODO(synk): AMNPE.sample() (stochastic inverse-autoregressive sampling)
    # is not implemented; only the forward log-density path is kernelized.
    print("KERNEL_OK")
</pallas_src>

<mosaic_0001>
module attributes {stable_mosaic.version = 11 : i64} {
  func.func @amnpe_kernel(%arg0: i32, %arg1: memref<16x128xf32, #tpu.memory_space<vmem>>, %arg2: memref<192x16xbf16, #tpu.memory_space<vmem>>, %arg3: memref<192x1xf32, #tpu.memory_space<vmem>>, %arg4: memref<128x4xbf16, #tpu.memory_space<vmem>>, %arg5: memref<192x64xbf16, #tpu.memory_space<vmem>>, %arg6: memref<192x1xf32, #tpu.memory_space<vmem>>, %arg7: memref<3x8x64xbf16, #tpu.memory_space<vmem>>, %arg8: memref<3x8x1xf32, #tpu.memory_space<vmem>>, %arg9: memref<1x128xf32, #tpu.memory_space<vmem>>) attributes {dimension_semantics = [#tpu.dimension_semantics<parallel>], iteration_bounds = array<i64: 1>, scalar_prefetch = 0 : i64, scratch_operands = 0 : i64, tpu.core_type = #tpu.core_type<tc>, window_params = [{transform_indices = @transform_0, window_bounds = array<i64: 16, 128>}, {pipeline_mode = #tpu.pipeline_mode<synchronous>, transform_indices = @transform_1, window_bounds = array<i64: 192, 16>}, {pipeline_mode = #tpu.pipeline_mode<synchronous>, transform_indices = @transform_2, window_bounds = array<i64: 192, 1>}, {pipeline_mode = #tpu.pipeline_mode<synchronous>, transform_indices = @transform_3, window_bounds = array<i64: 128, 4>}, {pipeline_mode = #tpu.pipeline_mode<synchronous>, transform_indices = @transform_4, window_bounds = array<i64: 192, 64>}, {pipeline_mode = #tpu.pipeline_mode<synchronous>, transform_indices = @transform_5, window_bounds = array<i64: 192, 1>}, {pipeline_mode = #tpu.pipeline_mode<synchronous>, transform_indices = @transform_6, window_bounds = array<i64: 3, 8, 64>}, {pipeline_mode = #tpu.pipeline_mode<synchronous>, transform_indices = @transform_7, window_bounds = array<i64: 3, 8, 1>}, {transform_indices = @transform_8, window_bounds = array<i64: 1, 128>}]} {
    %c0 = arith.constant 0 : index
    %c0_0 = arith.constant 0 : index
    %0 = vector.load %arg1[%c0, %c0_0] : memref<16x128xf32, #tpu.memory_space<vmem>>, vector<16x128xf32>
    %1 = arith.truncf %0 : vector<16x128xf32> to vector<16x128xbf16>
    %2 = vector.extract_strided_slice %0 {offsets = [0, 0], sizes = [4, 128], strides = [1, 1]} : vector<16x128xf32> to vector<4x128xf32>
    %c0_1 = arith.constant 0 : index
    %c0_2 = arith.constant 0 : index
    %3 = vector.load %arg2[%c0_1, %c0_2] : memref<192x16xbf16, #tpu.memory_space<vmem>>, vector<192x16xbf16>
    %cst = arith.constant dense<0.000000e+00> : vector<192x128xf32>
    %4 = tpu.matmul %3, %1, %cst {dimension_numbers = #tpu.dot_dimension_numbers<[1], [0], [0], [1], [0, 0, 1, 1], [], []>} : vector<192x16xbf16>, vector<16x128xbf16>, vector<192x128xf32> -> vector<192x128xf32>
    %c0_3 = arith.constant 0 : index
    %c0_4 = arith.constant 0 : index
    %5 = vector.load %arg3[%c0_3, %c0_4] : memref<192x1xf32, #tpu.memory_space<vmem>>, vector<192x1xf32>
    %6 = vector.broadcast %5 : vector<192x1xf32> to vector<192x128xf32>
    %7 = arith.addf %4, %6 : vector<192x128xf32>
    %cst_5 = arith.constant 0.000000e+00 : f32
    %8 = vector.broadcast %cst_5 : f32 to vector<4x128xf32>
    %9 = vector.extract_strided_slice %7 {offsets = [0, 0], sizes = [64, 128], strides = [1, 1]} : vector<192x128xf32> to vector<64x128xf32>
    %cst_6 = arith.constant 0.000000e+00 : f32
    %10 = vector.broadcast %cst_6 : f32 to vector<64x128xf32>
    %11 = arith.maximumf %9, %10 : vector<64x128xf32>
    %c0_7 = arith.constant 0 : index
    %c0_8 = arith.constant 0 : index
    %12 = vector.load %arg5[%c0_7, %c0_8] : memref<192x64xbf16, #tpu.memory_space<vmem>>, vector<64x64xbf16>
    %13 = arith.truncf %11 : vector<64x128xf32> to vector<64x128xbf16>
    %cst_9 = arith.constant dense<0.000000e+00> : vector<64x128xf32>
    %14 = tpu.matmul %12, %13, %cst_9 {dimension_numbers = #tpu.dot_dimension_numbers<[1], [0], [0], [1], [0, 0, 1, 1], [], []>} : vector<64x64xbf16>, vector<64x128xbf16>, vector<64x128xf32> -> vector<64x128xf32>
    %c0_10 = arith.constant 0 : index
    %c0_11 = arith.constant 0 : index
    %15 = vector.load %arg6[%c0_10, %c0_11] : memref<192x1xf32, #tpu.memory_space<vmem>>, vector<64x1xf32>
    %16 = vector.broadcast %15 : vector<64x1xf32> to vector<64x128xf32>
    %17 = arith.addf %14, %16 : vector<64x128xf32>
    %cst_12 = arith.constant 0.000000e+00 : f32
    %18 = vector.broadcast %cst_12 : f32 to vector<64x128xf32>
    %19 = arith.maximumf %17, %18 : vector<64x128xf32>
    %c0_13 = arith.constant 0 : index
    %c0_14 = arith.constant 0 : index
    %c0_15 = arith.constant 0 : index
    %20 = vector.load %arg7[%c0_13, %c0_14, %c0_15] : memref<3x8x64xbf16, #tpu.memory_space<vmem>>, vector<1x8x64xbf16>
    %21 = vector.shape_cast %20 : vector<1x8x64xbf16> to vector<8x64xbf16>
    %22 = arith.truncf %19 : vector<64x128xf32> to vector<64x128xbf16>
    %cst_16 = arith.constant dense<0.000000e+00> : vector<8x128xf32>
    %23 = tpu.matmul %21, %22, %cst_16 {dimension_numbers = #tpu.dot_dimension_numbers<[1], [0], [0], [1], [0, 0, 1, 1], [], []>} : vector<8x64xbf16>, vector<64x128xbf16>, vector<8x128xf32> -> vector<8x128xf32>
    %c0_17 = arith.constant 0 : index
    %c0_18 = arith.constant 0 : index
    %c0_19 = arith.constant 0 : index
    %24 = vector.load %arg8[%c0_17, %c0_18, %c0_19] : memref<3x8x1xf32, #tpu.memory_space<vmem>>, vector<1x8x1xf32>
    %25 = vector.shape_cast %24 : vector<1x8x1xf32> to vector<8x1xf32>
    %26 = vector.broadcast %25 : vector<8x1xf32> to vector<8x128xf32>
    %27 = arith.addf %23, %26 : vector<8x128xf32>
    %28 = vector.extract_strided_slice %27 {offsets = [0, 0], sizes = [4, 128], strides = [1, 1]} : vector<8x128xf32> to vector<4x128xf32>
    %29 = vector.extract_strided_slice %27 {offsets = [4, 0], sizes = [4, 128], strides = [1, 1]} : vector<8x128xf32> to vector<4x128xf32>
    %30 = math.absf %29 : vector<4x128xf32>
    %cst_20 = arith.constant 0.144764826 : f32
    %31 = vector.broadcast %cst_20 : f32 to vector<4x128xf32>
    %32 = arith.mulf %30, %31 : vector<4x128xf32>
    %cst_21 = arith.constant 1.000000e+00 : f32
    %33 = vector.broadcast %cst_21 : f32 to vector<4x128xf32>
    %34 = arith.addf %33, %32 : vector<4x128xf32>
    %35 = tpu.reciprocal %34 {approx = true} : vector<4x128xf32> -> vector<4x128xf32>
    %36 = arith.mulf %29, %35 : vector<4x128xf32>
    %37 = math.exp %36 : vector<4x128xf32>
    %38 = arith.mulf %2, %37 : vector<4x128xf32>
    %39 = arith.addf %38, %28 : vector<4x128xf32>
    %40 = arith.addf %8, %36 : vector<4x128xf32>
    %41 = vector.extract_strided_slice %7 {offsets = [64, 0], sizes = [64, 128], strides = [1, 1]} : vector<192x128xf32> to vector<64x128xf32>
    %c0_22 = arith.constant 0 : index
    %c0_23 = arith.constant 0 : index
    %42 = vector.load %arg4[%c0_22, %c0_23] : memref<128x4xbf16, #tpu.memory_space<vmem>>, vector<64x4xbf16>
    %43 = arith.truncf %39 : vector<4x128xf32> to vector<4x128xbf16>
    %cst_24 = arith.constant dense<0.000000e+00> : vector<64x128xf32>
    %44 = tpu.matmul %42, %43, %cst_24 {dimension_numbers = #tpu.dot_dimension_numbers<[1], [0], [0], [1], [0, 0, 1, 1], [], []>} : vector<64x4xbf16>, vector<4x128xbf16>, vector<64x128xf32> -> vector<64x128xf32>
    %45 = arith.addf %41, %44 : vector<64x128xf32>
    %cst_25 = arith.constant 0.000000e+00 : f32
    %46 = vector.broadcast %cst_25 : f32 to vector<64x128xf32>
    %47 = arith.maximumf %45, %46 : vector<64x128xf32>
    %c64 = arith.constant 64 : index
    %c0_26 = arith.constant 0 : index
    %48 = vector.load %arg5[%c64, %c0_26] : memref<192x64xbf16, #tpu.memory_space<vmem>>, vector<64x64xbf16>
    %49 = arith.truncf %47 : vector<64x128xf32> to vector<64x128xbf16>
    %cst_27 = arith.constant dense<0.000000e+00> : vector<64x128xf32>
    %50 = tpu.matmul %48, %49, %cst_27 {dimension_numbers = #tpu.dot_dimension_numbers<[1], [0], [0], [1], [0, 0, 1, 1], [], []>} : vector<64x64xbf16>, vector<64x128xbf16>, vector<64x128xf32> -> vector<64x128xf32>
    %c64_28 = arith.constant 64 : index
    %c0_29 = arith.constant 0 : index
    %51 = vector.load %arg6[%c64_28, %c0_29] : memref<192x1xf32, #tpu.memory_space<vmem>>, vector<64x1xf32>
    %52 = vector.broadcast %51 : vector<64x1xf32> to vector<64x128xf32>
    %53 = arith.addf %50, %52 : vector<64x128xf32>
    %cst_30 = arith.constant 0.000000e+00 : f32
    %54 = vector.broadcast %cst_30 : f32 to vector<64x128xf32>
    %55 = arith.maximumf %53, %54 : vector<64x128xf32>
    %c1 = arith.constant 1 : index
    %c0_31 = arith.constant 0 : index
    %c0_32 = arith.constant 0 : index
    %56 = vector.load %arg7[%c1, %c0_31, %c0_32] : memref<3x8x64xbf16, #tpu.memory_space<vmem>>, vector<1x8x64xbf16>
    %57 = vector.shape_cast %56 : vector<1x8x64xbf16> to vector<8x64xbf16>
    %58 = arith.truncf %55 : vector<64x128xf32> to vector<64x128xbf16>
    %cst_33 = arith.constant dense<0.000000e+00> : vector<8x128xf32>
    %59 = tpu.matmul %57, %58, %cst_33 {dimension_numbers = #tpu.dot_dimension_numbers<[1], [0], [0], [1], [0, 0, 1, 1], [], []>} : vector<8x64xbf16>, vector<64x128xbf16>, vector<8x128xf32> -> vector<8x128xf32>
    %c1_34 = arith.constant 1 : index
    %c0_35 = arith.constant 0 : index
    %c0_36 = arith.constant 0 : index
    %60 = vector.load %arg8[%c1_34, %c0_35, %c0_36] : memref<3x8x1xf32, #tpu.memory_space<vmem>>, vector<1x8x1xf32>
    %61 = vector.shape_cast %60 : vector<1x8x1xf32> to vector<8x1xf32>
    %62 = vector.broadcast %61 : vector<8x1xf32> to vector<8x128xf32>
    %63 = arith.addf %59, %62 : vector<8x128xf32>
    %64 = vector.extract_strided_slice %63 {offsets = [0, 0], sizes = [4, 128], strides = [1, 1]} : vector<8x128xf32> to vector<4x128xf32>
    %65 = vector.extract_strided_slice %63 {offsets = [4, 0], sizes = [4, 128], strides = [1, 1]} : vector<8x128xf32> to vector<4x128xf32>
    %66 = math.absf %65 : vector<4x128xf32>
    %cst_37 = arith.constant 0.144764826 : f32
    %67 = vector.broadcast %cst_37 : f32 to vector<4x128xf32>
    %68 = arith.mulf %66, %67 : vector<4x128xf32>
    %cst_38 = arith.constant 1.000000e+00 : f32
    %69 = vector.broadcast %cst_38 : f32 to vector<4x128xf32>
    %70 = arith.addf %69, %68 : vector<4x128xf32>
    %71 = tpu.reciprocal %70 {approx = true} : vector<4x128xf32> -> vector<4x128xf32>
    %72 = arith.mulf %65, %71 : vector<4x128xf32>
    %73 = math.exp %72 : vector<4x128xf32>
    %74 = arith.mulf %39, %73 : vector<4x128xf32>
    %75 = arith.addf %74, %64 : vector<4x128xf32>
    %76 = arith.addf %40, %72 : vector<4x128xf32>
    %77 = vector.extract_strided_slice %7 {offsets = [128, 0], sizes = [64, 128], strides = [1, 1]} : vector<192x128xf32> to vector<64x128xf32>
    %c64_39 = arith.constant 64 : index
    %c0_40 = arith.constant 0 : index
    %78 = vector.load %arg4[%c64_39, %c0_40] : memref<128x4xbf16, #tpu.memory_space<vmem>>, vector<64x4xbf16>
    %79 = arith.truncf %75 : vector<4x128xf32> to vector<4x128xbf16>
    %cst_41 = arith.constant dense<0.000000e+00> : vector<64x128xf32>
    %80 = tpu.matmul %78, %79, %cst_41 {dimension_numbers = #tpu.dot_dimension_numbers<[1], [0], [0], [1], [0, 0, 1, 1], [], []>} : vector<64x4xbf16>, vector<4x128xbf16>, vector<64x128xf32> -> vector<64x128xf32>
    %81 = arith.addf %77, %80 : vector<64x128xf32>
    %cst_42 = arith.constant 0.000000e+00 : f32
    %82 = vector.broadcast %cst_42 : f32 to vector<64x128xf32>
    %83 = arith.maximumf %81, %82 : vector<64x128xf32>
    %c128 = arith.constant 128 : index
    %c0_43 = arith.constant 0 : index
    %84 = vector.load %arg5[%c128, %c0_43] : memref<192x64xbf16, #tpu.memory_space<vmem>>, vector<64x64xbf16>
    %85 = arith.truncf %83 : vector<64x128xf32> to vector<64x128xbf16>
    %cst_44 = arith.constant dense<0.000000e+00> : vector<64x128xf32>
    %86 = tpu.matmul %84, %85, %cst_44 {dimension_numbers = #tpu.dot_dimension_numbers<[1], [0], [0], [1], [0, 0, 1, 1], [], []>} : vector<64x64xbf16>, vector<64x128xbf16>, vector<64x128xf32> -> vector<64x128xf32>
    %c128_45 = arith.constant 128 : index
    %c0_46 = arith.constant 0 : index
    %87 = vector.load %arg6[%c128_45, %c0_46] : memref<192x1xf32, #tpu.memory_space<vmem>>, vector<64x1xf32>
    %88 = vector.broadcast %87 : vector<64x1xf32> to vector<64x128xf32>
    %89 = arith.addf %86, %88 : vector<64x128xf32>
    %cst_47 = arith.constant 0.000000e+00 : f32
    %90 = vector.broadcast %cst_47 : f32 to vector<64x128xf32>
    %91 = arith.maximumf %89, %90 : vector<64x128xf32>
    %c2 = arith.constant 2 : index
    %c0_48 = arith.constant 0 : index
    %c0_49 = arith.constant 0 : index
    %92 = vector.load %arg7[%c2, %c0_48, %c0_49] : memref<3x8x64xbf16, #tpu.memory_space<vmem>>, vector<1x8x64xbf16>
    %93 = vector.shape_cast %92 : vector<1x8x64xbf16> to vector<8x64xbf16>
    %94 = arith.truncf %91 : vector<64x128xf32> to vector<64x128xbf16>
    %cst_50 = arith.constant dense<0.000000e+00> : vector<8x128xf32>
    %95 = tpu.matmul %93, %94, %cst_50 {dimension_numbers = #tpu.dot_dimension_numbers<[1], [0], [0], [1], [0, 0, 1, 1], [], []>} : vector<8x64xbf16>, vector<64x128xbf16>, vector<8x128xf32> -> vector<8x128xf32>
    %c2_51 = arith.constant 2 : index
    %c0_52 = arith.constant 0 : index
    %c0_53 = arith.constant 0 : index
    %96 = vector.load %arg8[%c2_51, %c0_52, %c0_53] : memref<3x8x1xf32, #tpu.memory_space<vmem>>, vector<1x8x1xf32>
    %97 = vector.shape_cast %96 : vector<1x8x1xf32> to vector<8x1xf32>
    %98 = vector.broadcast %97 : vector<8x1xf32> to vector<8x128xf32>
    %99 = arith.addf %95, %98 : vector<8x128xf32>
    %100 = vector.extract_strided_slice %99 {offsets = [0, 0], sizes = [4, 128], strides = [1, 1]} : vector<8x128xf32> to vector<4x128xf32>
    %101 = vector.extract_strided_slice %99 {offsets = [4, 0], sizes = [4, 128], strides = [1, 1]} : vector<8x128xf32> to vector<4x128xf32>
    %102 = math.absf %101 : vector<4x128xf32>
    %cst_54 = arith.constant 0.144764826 : f32
    %103 = vector.broadcast %cst_54 : f32 to vector<4x128xf32>
    %104 = arith.mulf %102, %103 : vector<4x128xf32>
    %cst_55 = arith.constant 1.000000e+00 : f32
    %105 = vector.broadcast %cst_55 : f32 to vector<4x128xf32>
    %106 = arith.addf %105, %104 : vector<4x128xf32>
    %107 = tpu.reciprocal %106 {approx = true} : vector<4x128xf32> -> vector<4x128xf32>
    %108 = arith.mulf %101, %107 : vector<4x128xf32>
    %109 = math.exp %108 : vector<4x128xf32>
    %110 = arith.mulf %75, %109 : vector<4x128xf32>
    %111 = arith.addf %110, %100 : vector<4x128xf32>
    %112 = arith.addf %76, %108 : vector<4x128xf32>
    %cst_56 = arith.constant 5.000000e-01 : f32
    %113 = vector.broadcast %cst_56 : f32 to vector<4x128xf32>
    %114 = arith.mulf %113, %111 : vector<4x128xf32>
    %115 = arith.mulf %114, %111 : vector<4x128xf32>
    %116 = arith.subf %112, %115 : vector<4x128xf32>
    %cst_57 = arith.constant dense<0.000000e+00> : vector<128xf32>
    %117 = vector.multi_reduction <add>, %116, %cst_57 [0] : vector<4x128xf32> to vector<128xf32>
    %118 = vector.shape_cast %117 : vector<128xf32> to vector<1x128xf32>
    %cst_58 = arith.constant 3.67575407 : f32
    %119 = vector.broadcast %cst_58 : f32 to vector<1x128xf32>
    %120 = arith.subf %118, %119 : vector<1x128xf32>
    %c0_59 = arith.constant 0 : index
    %c0_60 = arith.constant 0 : index
    %121 = vector.load %arg9[%c0_59, %c0_60] : memref<1x128xf32, #tpu.memory_space<vmem>>, vector<1x128xf32>
    tpu.vector_store %arg9[%c0_59, %c0_60], %120 {strides = array<i32>} : memref<1x128xf32, #tpu.memory_space<vmem>>, vector<1x128xf32>,
    return
  }
  func.func @transform_0(%arg0: i32) -> (i32, i32) {
    %c0_i32 = arith.constant 0 : i32
    %c0_i32_0 = arith.constant 0 : i32
    return %c0_i32, %arg0 : i32, i32
  }
  func.func @transform_1(%arg0: i32) -> (i32, i32) {
    %c0_i32 = arith.constant 0 : i32
    %c0_i32_0 = arith.constant 0 : i32
    %c0_i32_1 = arith.constant 0 : i32
    return %c0_i32, %c0_i32_0 : i32, i32
  }
  func.func @transform_2(%arg0: i32) -> (i32, i32) {
    %c0_i32 = arith.constant 0 : i32
    %c0_i32_0 = arith.constant 0 : i32
    %c0_i32_1 = arith.constant 0 : i32
    return %c0_i32, %c0_i32_0 : i32, i32
  }
  func.func @transform_3(%arg0: i32) -> (i32, i32) {
    %c0_i32 = arith.constant 0 : i32
    %c0_i32_0 = arith.constant 0 : i32
    %c0_i32_1 = arith.constant 0 : i32
    return %c0_i32, %c0_i32_0 : i32, i32
  }
  func.func @transform_4(%arg0: i32) -> (i32, i32) {
    %c0_i32 = arith.constant 0 : i32
    %c0_i32_0 = arith.constant 0 : i32
    %c0_i32_1 = arith.constant 0 : i32
    return %c0_i32, %c0_i32_0 : i32, i32
  }
  func.func @transform_5(%arg0: i32) -> (i32, i32) {
    %c0_i32 = arith.constant 0 : i32
    %c0_i32_0 = arith.constant 0 : i32
    %c0_i32_1 = arith.constant 0 : i32
    return %c0_i32, %c0_i32_0 : i32, i32
  }
  func.func @transform_6(%arg0: i32) -> (i32, i32, i32) {
    %c0_i32 = arith.constant 0 : i32
    %c0_i32_0 = arith.constant 0 : i32
    %c0_i32_1 = arith.constant 0 : i32
    %c0_i32_2 = arith.constant 0 : i32
    return %c0_i32, %c0_i32_0, %c0_i32_1 : i32, i32, i32
  }
  func.func @transform_7(%arg0: i32) -> (i32, i32, i32) {
    %c0_i32 = arith.constant 0 : i32
    %c0_i32_0 = arith.constant 0 : i32
    %c0_i32_1 = arith.constant 0 : i32
    %c0_i32_2 = arith.constant 0 : i32
    return %c0_i32, %c0_i32_0, %c0_i32_1 : i32, i32, i32
  }
  func.func @transform_8(%arg0: i32) -> (i32, i32) {
    %c0_i32 = arith.constant 0 : i32
    %c0_i32_0 = arith.constant 0 : i32
    return %c0_i32, %arg0 : i32, i32
  }
}

</mosaic_0001>

<bundles_post_ra>
// kernel: amnpe_log_prob.1
= control target key start
LH: loop header
LB: loop body
LE: loop exit
PB: predicated region body
PF: predicated region fallthrough
CT: control target
= control target key end

     0   :  { %v1307_v0 = vmov 0   ;;  %vm261_vm0 = vcmask 130048   ;;  %vm455_vm1 = vcmask 523264   ;;  %vm587_vm2 = vcmask 1041408   ;;  %s1697_s2 = inlined_call_operand.vmem [shape: f32[192,1], index: 2, kind: input, shape index: {}]   ;;  %s1698_s0 = inlined_call_operand.vmem [shape: f32[16,128], index: 0, kind: input, shape index: {}]   ;;  %s1699_s1 = inlined_call_operand.vmem [shape: bf16[192,16], index: 1, kind: input, shape index: {}]   ;;  %s1700_s5 = inlined_call_operand.vmem [shape: f32[192,1], index: 5, kind: input, shape index: {}]   ;;  %s1701_s7 = inlined_call_operand.vmem [shape: f32[3,8,1], index: 7, kind: input, shape index: {}]   ;;  %s1702_s4 = inlined_call_operand.vmem [shape: bf16[192,64], index: 4, kind: input, shape index: {}]   ;;  %s1703_s6 = inlined_call_operand.vmem [shape: bf16[3,8,64], index: 6, kind: input, shape index: {}]   ;;  %s1704_s3 = inlined_call_operand.vmem [shape: bf16[128,4], index: 3, kind: input, shape index: {}]   ;;  %s1705_s8 = inlined_call_operand.vmem [shape: f32[1,128], index: 8, kind: output, shape index: {}]  }
   0x1   :  { %1294 = vset.pattern.permute.xlu2 %v1307_v0  ;;  %1293 = vset.pattern.permute.xlu1 %v1307_v0  ;;  %v63_v1 = vld [vmem:[%s1697_s2 + $0x30] sm:$0xff]  ;;  %v61_v2 = vld [vmem:[%s1697_s2 + $0x20] sm:$0xff]  ;;  %v31_v5 = vld [vmem:[%s1698_s0 + $0x8] sm:$0xff]  ;;  %vm574_vm3 = vcmask 31744   ;;  %vm1076_vm4 = vcmask 1043456  }
   0x2   :  { %v59_v3 = vld [vmem:[%s1697_s2 + $0x10] sm:$0xff]  ;;  %1292 = vset.pattern.permute.xlu0 %v1307_v0  ;;  %103 = vperm.xlu1 %1293, %v61_v2   ;;  %v1365_v4 = vld [vmem:[%s1698_s0] sm:$0xff]  ;;  %v1267_v8 = vld [vmem:[%s1699_s1 + $0x48] sm:$0xff] }
   0x3   :  { %113 = vperm.xlu0 %1292, %v63_v1   ;;  %93 = vperm.xlu2 %1294, %v59_v3   ;;  %v32_v6 = vpack.c.bf16 %v31_v5, %v1365_v4  ;;  %v1258_v7 = vld [vmem:[%s1699_s1] sm:$0xff]  ;;  %v62_v9 = vld [vmem:[%s1697_s2 + $0x28] sm:$0xff]  ;;  %v64_v10 = vld [vmem:[%s1697_s2 + $0x38] sm:$0xff] }
   0x4   :  { %v60_v11 = vld [vmem:[%s1697_s2 + $0x18] sm:$0xff]  ;;  %v58_v12 = vld [vmem:[%s1697_s2 + $0x8] sm:$0xff]  ;;  %v393_v13 = vld [vmem:[%s1700_s5 + $0x30] sm:$0xff] }
   0x5   :  { %305 = vmatpush.bf16.msra.mxu0 %v32_v6  ;;  %1290 = vmatpush.bf16.msra.mxu2 %v32_v6  ;;  %v57_v14 = vld [vmem:[%s1697_s2] sm:$0xff]  ;;  %v1259_v15 = vld [vmem:[%s1699_s1 + $0x8] sm:$0xff]  ;;  %v1268_v16 = vld [vmem:[%s1699_s1 + $0x50] sm:$0xff] }
   0x6   :  { %v391_v17 = vld [vmem:[%s1700_s5 + $0x20] sm:$0xff]  ;;  %v392_v18 = vld [vmem:[%s1700_s5 + $0x28] sm:$0xff]  ;;  %v394_v19 = vld [vmem:[%s1700_s5 + $0x38] sm:$0xff] }
   0x7   :  { %v390_v20 = vld [vmem:[%s1700_s5 + $0x18] sm:$0xff]  ;;  %v387_v21 = vld [vmem:[%s1700_s5] sm:$0xff]  ;;  %v389_v22 = vld [vmem:[%s1700_s5 + $0x10] sm:$0xff] }
   0x8   :  { %1138 = vmatmul.msk.bf16.vlgmr.msra.gmra.mxu0 %vm261_vm0, %v1258_v7  ;;  %1147 = vmatmul.msk.bf16.vlgmr.msra.gmra.mxu2 %vm261_vm0, %v1267_v8  ;;  %v1260_v23 = vld [vmem:[%s1699_s1 + $0x10] sm:$0xff]  ;;  %v1269_v24 = vld [vmem:[%s1699_s1 + $0x58] sm:$0xff]  ;;  %v510_v25 = vld [vmem:[%s1701_s7] sm:$0xff] }
   0x9   :  { %v71_v26 = vld [vmem:[%s1697_s2 + $0x70] sm:$0xff]  ;;  %v388_v27 = vld [vmem:[%s1700_s5 + $0x8] sm:$0xff]  ;;  %v69_v28 = vld [vmem:[%s1697_s2 + $0x60] sm:$0xff] }
   0xa   :  { %108 = vperm.xlu1 %1293, %v62_v9   ;;  %v70_v29 = vld [vmem:[%s1697_s2 + $0x68] sm:$0xff]  ;;  %v72_v30 = vld [vmem:[%s1697_s2 + $0x78] sm:$0xff]  ;;  %v65_v33 = vld [vmem:[%s1697_s2 + $0x40] sm:$0xff] }
   0xb   :  { %118 = vperm.xlu0 %1292, %v64_v10   ;;  %98 = vperm.xlu2 %1294, %v60_v11   ;;  %v1261_v31 = vld [vmem:[%s1699_s1 + $0x18] sm:$0xff]  ;;  %v67_v34 = vld [vmem:[%s1697_s2 + $0x50] sm:$0xff]  ;;  %v66_v37 = vld [vmem:[%s1697_s2 + $0x48] sm:$0xff] }
   0xc   :  { %v68_v32 = vld [vmem:[%s1697_s2 + $0x58] sm:$0xff]  ;;  %v654_v35 = vld [vmem:[%s1700_s5 + $0x70] sm:$0xff]  ;;  %v1262_v38 = vld [vmem:[%s1699_s1 + $0x20] sm:$0xff] }
   0xd   :  { %v655_v36 = vld [vmem:[%s1700_s5 + $0x78] sm:$0xff]  ;;  %v653_v39 = vld [vmem:[%s1700_s5 + $0x68] sm:$0xff]  ;;  %v650_v40 = vld [vmem:[%s1700_s5 + $0x50] sm:$0xff] }
   0xe   :  { %v652_v41 = vld [vmem:[%s1700_s5 + $0x60] sm:$0xff]  ;;  %v649_v43 = vld [vmem:[%s1700_s5 + $0x48] sm:$0xff]  ;;  %v651_v44 = vld [vmem:[%s1700_s5 + $0x58] sm:$0xff] }
   0xf   :  { %v648_v42 = vld [vmem:[%s1700_s5 + $0x40] sm:$0xff]  ;;  %v1263_v45 = vld [vmem:[%s1699_s1 + $0x28] sm:$0xff]  ;;  %v79_v46 = vld [vmem:[%s1697_s2 + $0xb0] sm:$0xff] }
  0x10   :  { %v80_v47 = vld [vmem:[%s1697_s2 + $0xb8] sm:$0xff]  ;;  %v1212_v48 = vld [vmem:[%s1701_s7 + $0x8] sm:$0xff]  ;;  %v75_v50 = vld [vmem:[%s1697_s2 + $0x90] sm:$0xff] }
  0x11   :  { %v78_v49 = vld [vmem:[%s1697_s2 + $0xa8] sm:$0xff]  ;;  %v77_v51 = vld [vmem:[%s1697_s2 + $0xa0] sm:$0xff]  ;;  %v1264_v52 = vld [vmem:[%s1699_s1 + $0x30] sm:$0xff] }
  0x12   :  { %88 = vperm.xlu1 %1293, %v58_v12   ;;  %v73_v53 = vld [vmem:[%s1697_s2 + $0x80] sm:$0xff]  ;;  %v74_v54 = vld [vmem:[%s1697_s2 + $0x88] sm:$0xff]  ;;  %v76_v55 = vld [vmem:[%s1697_s2 + $0x98] sm:$0xff] }
  0x13   :  { %427 = vperm.xlu2 %1294, %v393_v13   ;;  %83 = vperm.xlu0 %1292, %v57_v14   ;;  %v915_v56 = vld [vmem:[%s1700_s5 + $0xb8] sm:$0xff]  ;;  %v912_v57 = vld [vmem:[%s1700_s5 + $0xa0] sm:$0xff]  ;;  %v914_v58 = vld [vmem:[%s1700_s5 + $0xb0] sm:$0xff] }
  0x14   :  { %v1265_v59 = vld [vmem:[%s1699_s1 + $0x38] sm:$0xff]  ;;  %v910_v60 = vld [vmem:[%s1700_s5 + $0x90] sm:$0xff]  ;;  %v913_v62 = vld [vmem:[%s1700_s5 + $0xa8] sm:$0xff] }
  0x15   :  { %v911_v61 = vld [vmem:[%s1700_s5 + $0x98] sm:$0xff]  ;;  %v909_v63 = vld [vmem:[%s1700_s5 + $0x88] sm:$0xff]  ;;  %v1255_v0 = vld [vmem:[%s1701_s7 + $0x10] sm:$0xff] }
  0x16   :  { %v908_v1 = vld [vmem:[%s1700_s5 + $0x80] sm:$0xff] }
  0x17   :  { %v1266_v2 = vld [vmem:[%s1699_s1 + $0x40] sm:$0xff] }
  0x18   :  { %1139 = vmatmul.msk.bf16.gmra.mxu0 %vm261_vm0, %v1259_v15  ;;  %1148 = vmatmul.msk.bf16.gmra.mxu2 %vm261_vm0, %v1268_v16 }
  0x1a   :  { %417 = vperm.xlu1 %1293, %v391_v17  }
  0x1b   :  { %422 = vperm.xlu2 %1294, %v392_v18   ;;  %432 = vperm.xlu0 %1292, %v394_v19  }
  0x22   :  { %412 = vperm.xlu1 %1293, %v390_v20  }
  0x23   :  { %397 = vperm.xlu2 %1294, %v387_v21   ;;  %407 = vperm.xlu0 %1292, %v389_v22  }
  0x28   :  { %1140 = vmatmul.msk.bf16.gmra.mxu0 %vm261_vm0, %v1260_v23  ;;  %1149 = vmatmul.msk.bf16.gmra.mxu2 %vm261_vm0, %v1269_v24 }
  0x2a   :  { %513 = vperm.xlu1 %1293, %v510_v25  }
  0x2b   :  { %153 = vperm.xlu2 %1294, %v71_v26   ;;  %402 = vperm.xlu0 %1292, %v388_v27  }
  0x32   :  { %143 = vperm.xlu1 %1293, %v69_v28  }
  0x33   :  { %148 = vperm.xlu2 %1294, %v70_v29   ;;  %158 = vperm.xlu0 %1292, %v72_v30  }
  0x38   :  { %1141 = vmatmul.msk.bf16.gmra.mxu0 %vm261_vm0, %v1261_v31 }
  0x3a   :  { %138 = vperm.xlu1 %1293, %v68_v32  }
  0x3b   :  { %123 = vperm.xlu2 %1294, %v65_v33   ;;  %133 = vperm.xlu0 %1292, %v67_v34  }
  0x42   :  { %688 = vperm.xlu1 %1293, %v654_v35  }
  0x43   :  { %693 = vperm.xlu2 %1294, %v655_v36   ;;  %128 = vperm.xlu0 %1292, %v66_v37  }
  0x48   :  { %1142 = vmatmul.msk.bf16.gmra.mxu0 %vm261_vm0, %v1262_v38 }
  0x4a   :  { %683 = vperm.xlu1 %1293, %v653_v39  }
  0x4b   :  { %668 = vperm.xlu2 %1294, %v650_v40   ;;  %678 = vperm.xlu0 %1292, %v652_v41   ;;  %v1270_v40 = vld [vmem:[%s1702_s4] sm:$0xff]  ;;  %v1271_v41 = vld [vmem:[%s1702_s4 + $0x8] sm:$0xff] }
  0x52   :  { %658 = vperm.xlu1 %1293, %v648_v42   ;;  %v1272_v42 = vld [vmem:[%s1702_s4 + $0x10] sm:$0xff] }
  0x53   :  { %663 = vperm.xlu2 %1294, %v649_v43   ;;  %673 = vperm.xlu0 %1292, %v651_v44   ;;  %v1273_v43 = vld [vmem:[%s1702_s4 + $0x18] sm:$0xff] }
  0x58   :  { %1143 = vmatmul.msk.bf16.gmra.mxu0 %vm261_vm0, %v1263_v45 }
  0x5a   :  { %193 = vperm.xlu1 %1293, %v79_v46  }
  0x5b   :  { %198 = vperm.xlu2 %1294, %v80_v47   ;;  %775 = vperm.xlu0 %1292, %v1212_v48  }
  0x5d   :  { %v94_v13 = vpop.permute.xlu2 %93 }
  0x62   :  { %188 = vperm.xlu1 %1293, %v78_v49  }
  0x63   :  { %173 = vperm.xlu2 %1294, %v75_v50   ;;  %183 = vperm.xlu0 %1292, %v77_v51  }
  0x65   :  { %v99_v23 = vpop.permute.xlu2 %98 }
  0x68   :  { %1144 = vmatmul.msk.bf16.gmra.mxu0 %vm261_vm0, %v1264_v52 }
  0x6a   :  { %163 = vperm.xlu1 %1293, %v73_v53  }
  0x6b   :  { %168 = vperm.xlu2 %1294, %v74_v54   ;;  %178 = vperm.xlu0 %1292, %v76_v55  }
  0x6d   :  { %v428_v51 = vpop.permute.xlu2 %427 }
  0x72   :  { %953 = vperm.xlu1 %1293, %v915_v56  }
  0x73   :  { %938 = vperm.xlu2 %1294, %v912_v57   ;;  %948 = vperm.xlu0 %1292, %v914_v58  }
  0x74   :  { %v104_v11 = vpop.permute.xlu1 %103 }
  0x75   :  { %v114_v10 = vpop.permute.xlu0 %113  ;;  %v423_v56 = vpop.permute.xlu2 %422 }
  0x78   :  { %1145 = vmatmul.msk.bf16.gmra.mxu0 %vm261_vm0, %v1265_v59 }
  0x7a   :  { %928 = vperm.xlu1 %1293, %v910_v60  }
  0x7b   :  { %933 = vperm.xlu2 %1294, %v911_v61   ;;  %943 = vperm.xlu0 %1292, %v913_v62  }
  0x7c   :  { %v109_v15 = vpop.permute.xlu1 %108 }
  0x7d   :  { %v119_v14 = vpop.permute.xlu0 %118 }
  0x82   :  { %923 = vperm.xlu1 %1293, %v909_v63  }
  0x83   :  { %1035 = vperm.xlu2 %1294, %v1255_v0   ;;  %918 = vperm.xlu0 %1292, %v908_v1  }
  0x84   :  { %v89_v29 = vpop.permute.xlu1 %88 }
  0x85   :  { %v307_v3 = vpop.f32.mrf.mxu0  ;;  %v84_v30 = vpop.permute.xlu0 %83 }
  0x86   :  { %v308_v34 = vadd.f32 %v307_v3, %v84_v30 }
  0x88   :  { %1146 = vmatmul.msk.bf16.gmra.mxu0 %vm261_vm0, %v1266_v2  ;;  %v367_v38 = vmax.f32 %v308_v34, 0.0 }
  0x8c   :  { %v418_v53 = vpop.permute.xlu1 %417 }
  0x8d   :  { %v309_v5 = vpop.f32.mrf.mxu0  ;;  %v433_v50 = vpop.permute.xlu0 %432 }
  0x8e   :  { %v310_v31 = vadd.f32 %v309_v5, %v89_v29 }
  0x90   :  { %v368_v36 = vmax.f32 %v310_v31, 0.0 }
  0x92   :  { %v383_v39 = vpack.c.bf16 %v368_v36, %v367_v38 }
  0x94   :  { %v413_v63 = vpop.permute.xlu1 %412 }
  0x95   :  { %v312_v6 = vpop.f32.mrf.mxu0  ;;  %v408_v54 = vpop.permute.xlu0 %407 }
  0x96   :  { %v313_v27 = vadd.f32 %v312_v6, %v94_v13 }
  0x98   :  { %v369_v35 = vmax.f32 %v313_v27, 0.0 }
  0x9d   :  { %v314_v7 = vpop.f32.mrf.mxu0  ;;  %v403_v6 = vpop.permute.xlu0 %402 }
  0x9e   :  { %v315_v24 = vadd.f32 %v314_v7, %v99_v23 }
  0xa0   :  { %v370_v32 = vmax.f32 %v315_v24, 0.0  ;;  %v514_v24 = vpop.permute.xlu1 %513 }
  0xa2   :  { %v384_v37 = vpack.c.bf16 %v370_v32, %v369_v35 }
  0xa5   :  { %v317_v8 = vpop.f32.mrf.mxu0 }
  0xa6   :  { %v318_v20 = vadd.f32 %v317_v8, %v104_v11 }
  0xa8   :  { %v371_v28 = vmax.f32 %v318_v20, 0.0 }
  0xad   :  { %v319_v9 = vpop.f32.mrf.mxu0 }
  0xae   :  { %v320_v18 = vadd.f32 %v319_v9, %v109_v15 }
  0xb0   :  { %v372_v25 = vmax.f32 %v320_v18, 0.0  ;;  %v1583_v18 = vpop.f32.mrf.mxu2 }
  0xb2   :  { %v385_v33 = vpack.c.bf16 %v372_v25, %v371_v28 }
  0xb5   :  { %v322_v12 = vpop.f32.mrf.mxu0 }
  0xb6   :  { %v323_v16 = vadd.f32 %v322_v12, %v114_v10  ;;  %v398_v10 = vpop.permute.xlu2 %397 }
  0xb8   :  { %v373_v21 = vmax.f32 %v323_v16, 0.0 }
  0xbd   :  { %v324_v17 = vpop.f32.mrf.mxu0 }
  0xbe   :  { %v325_v19 = vadd.f32 %v324_v17, %v119_v14  ;;  %v505_v17 = vld [vmem:[%s1703_s6] sm:$0xf] }
  0xc0   :  { %v374_v22 = vmax.f32 %v325_v19, 0.0  ;;  %v1585_v19 = vpop.f32.mrf.mxu2 }
  0xc2   :  { %v386_v26 = vpack.c.bf16 %v374_v22, %v373_v21 }
  0xc4   :  { %472 = vmatpush.bf16.msra.mxu1 %v386_v26 }
  0xc8   :  { %473 = vmatpush.bf16.msra.mxu1 %v385_v33  ;;  %v1587_v20 = vpop.f32.mrf.mxu2 }
  0xcc   :  { %474 = vmatpush.bf16.msra.mxu1 %v384_v37 }
  0xd0   :  { %475 = vmatpush.bf16.msra.mxu1 %v383_v39  ;;  %v1589_v21 = vpop.f32.mrf.mxu2 }
  0xd3   :  { %1166 = vmatmul.msk.bf16.vlgmr.msra.gmra.mxu1 %vm455_vm1, %v1270_v40  ;;  %v1274_v40 = vld [vmem:[%s1704_s3] sm:$0xff] }
  0xd8   :  { %v1591_v22 = vpop.f32.mrf.mxu2 }
  0xe0   :  { %v1593_v23 = vpop.f32.mrf.mxu2 }
  0xe3   :  { %1167 = vmatmul.msk.bf16.gmra.mxu1 %vm455_vm1, %v1271_v41  ;;  %v1276_v41 = vld [vmem:[%s1704_s3 + $0x10] sm:$0xff] }
  0xf3   :  { %1168 = vmatmul.msk.bf16.gmra.mxu1 %vm455_vm1, %v1272_v42  ;;  %v1277_v42 = vld [vmem:[%s1704_s3 + $0x18] sm:$0xff] }
 0x103   :  { %1169 = vmatmul.msk.bf16.gmra.mxu1 %vm455_vm1, %v1273_v43  ;;  %v154_v43 = vpop.permute.xlu2 %153 }
 0x150   :  { %v477_v44 = vpop.f32.mrf.mxu1 }
 0x151   :  { %v478_v11 = vadd.f32 %v477_v44, %v398_v10  ;;  %v327_v44 = vpop.f32.mrf.mxu0 }
 0x153   :  { %v497_v15 = vmax.f32 %v478_v11, 0.0 }
 0x158   :  { %v479_v45 = vpop.f32.mrf.mxu1 }
 0x159   :  { %v480_v7 = vadd.f32 %v479_v45, %v403_v6  ;;  %v149_v45 = vpop.permute.xlu2 %148 }
 0x15b   :  { %v498_v13 = vmax.f32 %v480_v7, 0.0 }
 0x15d   :  { %v506_v16 = vpack.c.bf16 %v498_v13, %v497_v15 }
 0x160   :  { %v482_v46 = vpop.f32.mrf.mxu1 }
 0x161   :  { %v483_v3 = vadd.f32 %v482_v46, %v408_v54  ;;  %v329_v46 = vpop.f32.mrf.mxu0 }
 0x163   :  { %v499_v12 = vmax.f32 %v483_v3, 0.0 }
 0x168   :  { %v484_v47 = vpop.f32.mrf.mxu1 }
 0x169   :  { %v485_v0 = vadd.f32 %v484_v47, %v413_v63  ;;  %v124_v47 = vpop.permute.xlu2 %123 }
 0x16b   :  { %v500_v8 = vmax.f32 %v485_v0, 0.0 }
 0x16d   :  { %v507_v14 = vpack.c.bf16 %v500_v8, %v499_v12 }
 0x170   :  { %v487_v48 = vpop.f32.mrf.mxu1 }
 0x171   :  { %v488_v60 = vadd.f32 %v487_v48, %v418_v53  ;;  %v328_v48 = vadd.f32 %v327_v44, %v124_v47 }
 0x173   :  { %v501_v5 = vmax.f32 %v488_v60, 0.0  ;;  %v159_v60 = vpop.permute.xlu0 %158 }
 0x178   :  { %v489_v49 = vpop.f32.mrf.mxu1 }
 0x179   :  { %v490_v58 = vadd.f32 %v489_v49, %v423_v56 }
 0x17b   :  { %v502_v1 = vmax.f32 %v490_v58, 0.0  ;;  %v134_v0 = vpop.permute.xlu0 %133 }
 0x17d   :  { %v508_v9 = vpack.c.bf16 %v502_v1, %v501_v5 }
 0x180   :  { %v492_v52 = vpop.f32.mrf.mxu1 }
 0x181   :  { %v493_v55 = vadd.f32 %v492_v52, %v428_v51  ;;  %v332_v51 = vpop.f32.mrf.mxu0 }
 0x183   :  { %v503_v61 = vmax.f32 %v493_v55, 0.0 }
 0x188   :  { %v494_v57 = vpop.f32.mrf.mxu1 }
 0x189   :  { %v495_v59 = vadd.f32 %v494_v57, %v433_v50  ;;  %v334_v53 = vpop.f32.mrf.mxu0 }
 0x18b   :  { %v504_v62 = vmax.f32 %v495_v59, 0.0 }
 0x18d   :  { %v509_v2 = vpack.c.bf16 %v504_v62, %v503_v61  ;;  %v144_v62 = vpop.permute.xlu1 %143 }
 0x18f   :  { %523 = vmatpush.bf16.msrb.mxu2 %v509_v2 }
 0x191   :  { %v337_v55 = vpop.f32.mrf.mxu0 }
 0x192   :  { %v338_v8 = vadd.f32 %v337_v55, %v144_v62 }
 0x193   :  { %524 = vmatpush.bf16.msrb.mxu2 %v508_v9 }
 0x195   :  { %v139_v11 = vpop.permute.xlu1 %138 }
 0x196   :  { %v335_v12 = vadd.f32 %v334_v53, %v139_v11 }
 0x197   :  { %525 = vmatpush.bf16.msrb.mxu2 %v507_v14 }
 0x199   :  { %v339_v57 = vpop.f32.mrf.mxu0 }
 0x19a   :  { %v340_v3 = vadd.f32 %v339_v57, %v149_v45 }
 0x19b   :  { %526 = vmatpush.bf16.msrb.mxu2 %v506_v16  ;;  %v333_v16 = vadd.f32 %v332_v51, %v134_v0 }
 0x19e   :  { %1170 = vmatmul.msk.bf16.vlgmr.msrb.gmra.mxu2 %vm455_vm1, %v505_v17 }
 0x1a1   :  { %v342_v61 = vpop.f32.mrf.mxu0 }
 0x1a2   :  { %v343_v2 = vadd.f32 %v342_v61, %v154_v43 }
 0x1a9   :  { %v344_v1 = vpop.f32.mrf.mxu0 }
 0x1aa   :  { %v345_v5 = vadd.f32 %v344_v1, %v159_v60 }
 0x221   :  { %v528_v25 = vpop.f32.mrf.mxu2 }
 0x222   :  { %v529_v26 = vadd.f32 %v528_v25, %v514_v24 }
 0x224   :  { %v532_v27 = vand.u32 2147483647, %v529_v26 }
 0x226   :  { %v533_v28 = vmul.f32 0.14476483, %v532_v27 }
 0x228   :  { %v534_v29 = vadd.f32 1.0, %v533_v28 }
 0x229   :  { %v530_v30 = vpop.f32.mrf.mxu2 }
 0x22a   :  { %1295 = vrcp.f32 %v534_v29 }
 0x230   :  { %v1296_v31 = vpop.eup %1295 }
 0x231   :  { %v1595_v32 = vmul.f32 %v1296_v31, %v529_v26 }
 0x233   :  { %v537_v33 = vmul.f32 1.442695, %v1595_v32 }
 0x235   :  { %1297 = vpow2.f32 %v537_v33 }
 0x23b   :  { %v1298_v34 = vpop.eup %1297 }
 0x23c   :  { %v540_v35 = vrot.slane %v1298_v34, 4 }
 0x23e   :  { %v542_v36 = vmul.f32 %v540_v35, %v1365_v4  ;;  %v1275_v4 = vld [vmem:[%s1704_s3 + $0x8] sm:$0xff] }
 0x240   :  { %v1599_v37 = vadd.f32 %v542_v36, %v529_v26  ;;  %v129_v26 = vpop.permute.xlu0 %128 }
 0x241   :  { %v330_v27 = vadd.f32 %v329_v46, %v129_v26 }
 0x242   :  { %v553_v38 = vpack.c.bf16 %v1599_v37, %v1599_v37 }
 0x244   :  { %v589_v39 = vsel %vm587_vm2, %v553_v38, 0 }
 0x245   :  { %598 = vmatpush.bf16.msra.mxu3 %v589_v39 }
 0x248   :  { %1187 = vmatmul.msk.bf16.vlgmr.msra.gmra.mxu3 %vm574_vm3, %v1274_v40  ;;  %v1278_v40 = vld [vmem:[%s1702_s4 + $0x20] sm:$0xff] }
 0x258   :  { %1188 = vmatmul.msk.bf16.gmra.mxu3 %vm574_vm3, %v1275_v4  ;;  %v1279_v4 = vld [vmem:[%s1702_s4 + $0x28] sm:$0xff] }
 0x268   :  { %1189 = vmatmul.msk.bf16.gmra.mxu3 %vm574_vm3, %v1276_v41  ;;  %v1280_v41 = vld [vmem:[%s1702_s4 + $0x30] sm:$0xff] }
 0x278   :  { %1190 = vmatmul.msk.bf16.gmra.mxu3 %vm574_vm3, %v1277_v42  ;;  %v1281_v42 = vld [vmem:[%s1702_s4 + $0x38] sm:$0xff] }
 0x2cb   :  { %v600_v49 = vpop.f32.mrf.mxu3 }
 0x2cc   :  { %v620_v50 = vadd.f32 %v600_v49, %v328_v48  ;;  %v694_v49 = vpop.permute.xlu2 %693 }
 0x2ce   :  { %v628_v38 = vmax.f32 %v620_v50, 0.0  ;;  %v689_v50 = vpop.permute.xlu1 %688 }
 0x2d3   :  { %v602_v52 = vpop.f32.mrf.mxu3 }
 0x2d4   :  { %v621_v30 = vadd.f32 %v602_v52, %v330_v27  ;;  %v679_v52 = vpop.permute.xlu0 %678  ;;  %v669_v53 = vpop.permute.xlu2 %668 }
 0x2d6   :  { %v629_v35 = vmax.f32 %v621_v30, 0.0  ;;  %v684_v55 = vpop.permute.xlu1 %683 }
 0x2d8   :  { %v644_v39 = vpack.c.bf16 %v629_v35, %v628_v38 }
 0x2db   :  { %v605_v54 = vpop.f32.mrf.mxu3 }
 0x2dc   :  { %v622_v28 = vadd.f32 %v605_v54, %v333_v16  ;;  %v674_v62 = vpop.permute.xlu0 %673  ;;  %v1211_v16 = vld [vmem:[%s1703_s6 + $0x4] sm:$0xf] }
 0x2de   :  { %v630_v34 = vmax.f32 %v622_v28, 0.0 }
 0x2e3   :  { %v607_v56 = vpop.f32.mrf.mxu3 }
 0x2e4   :  { %v623_v17 = vadd.f32 %v607_v56, %v335_v12 }
 0x2e6   :  { %v631_v31 = vmax.f32 %v623_v17, 0.0  ;;  %v776_v17 = vpop.permute.xlu0 %775 }
 0x2e8   :  { %v645_v36 = vpack.c.bf16 %v631_v31, %v630_v34 }
 0x2eb   :  { %v610_v58 = vpop.f32.mrf.mxu3 }
 0x2ec   :  { %v624_v13 = vadd.f32 %v610_v58, %v338_v8 }
 0x2ee   :  { %v632_v29 = vmax.f32 %v624_v13, 0.0 }
 0x2f3   :  { %v612_v59 = vpop.f32.mrf.mxu3 }
 0x2f4   :  { %v625_v9 = vadd.f32 %v612_v59, %v340_v3 }
 0x2f6   :  { %v633_v24 = vmax.f32 %v625_v9, 0.0  ;;  %v659_v9 = vpop.permute.xlu1 %658 }
 0x2f8   :  { %v646_v33 = vpack.c.bf16 %v633_v24, %v632_v29 }
 0x2fb   :  { %v615_v63 = vpop.f32.mrf.mxu3 }
 0x2fc   :  { %v626_v6 = vadd.f32 %v615_v63, %v343_v2 }
 0x2fe   :  { %v634_v14 = vmax.f32 %v626_v6, 0.0 }
 0x303   :  { %v617_v7 = vpop.f32.mrf.mxu3 }
 0x304   :  { %v627_v10 = vadd.f32 %v617_v7, %v345_v5  ;;  %v664_v5 = vpop.permute.xlu2 %663 }
 0x306   :  { %v635_v15 = vmax.f32 %v627_v10, 0.0 }
 0x308   :  { %v647_v25 = vpack.c.bf16 %v635_v15, %v634_v14 }
 0x30a   :  { %732 = vmatpush.bf16.msra.mxu2 %v647_v25 }
 0x30e   :  { %733 = vmatpush.bf16.msra.mxu2 %v646_v33 }
 0x312   :  { %734 = vmatpush.bf16.msra.mxu2 %v645_v36 }
 0x316   :  { %735 = vmatpush.bf16.msra.mxu2 %v644_v39 }
 0x319   :  { %1207 = vmatmul.msk.bf16.vlgmr.msra.gmra.mxu2 %vm455_vm1, %v1278_v40 }
 0x329   :  { %1208 = vmatmul.msk.bf16.gmra.mxu2 %vm455_vm1, %v1279_v4  ;;  %v1282_v4 = vld [vmem:[%s1704_s3 + $0x20] sm:$0xff] }
 0x339   :  { %1209 = vmatmul.msk.bf16.gmra.mxu2 %vm455_vm1, %v1280_v41  ;;  %v1283_v41 = vld [vmem:[%s1704_s3 + $0x28] sm:$0xff] }
 0x349   :  { %1210 = vmatmul.msk.bf16.gmra.mxu2 %vm455_vm1, %v1281_v42  ;;  %v1285_v42 = vld [vmem:[%s1704_s3 + $0x38] sm:$0xff] }
 0x39c   :  { %v737_v43 = vpop.f32.mrf.mxu2 }
 0x39d   :  { %v738_v10 = vadd.f32 %v737_v43, %v659_v9 }
 0x39f   :  { %v757_v14 = vmax.f32 %v738_v10, 0.0 }
 0x3a4   :  { %v739_v44 = vpop.f32.mrf.mxu2 }
 0x3a5   :  { %v740_v6 = vadd.f32 %v739_v44, %v664_v5 }
 0x3a7   :  { %v758_v12 = vmax.f32 %v740_v6, 0.0 }
 0x3a9   :  { %v767_v15 = vpack.c.bf16 %v758_v12, %v757_v14 }
 0x3ac   :  { %v742_v45 = vpop.f32.mrf.mxu2 }
 0x3ad   :  { %v743_v2 = vadd.f32 %v742_v45, %v669_v53 }
 0x3af   :  { %v759_v11 = vmax.f32 %v743_v2, 0.0 }
 0x3b4   :  { %v744_v46 = vpop.f32.mrf.mxu2 }
 0x3b5   :  { %v745_v63 = vadd.f32 %v744_v46, %v674_v62 }
 0x3b7   :  { %v760_v7 = vmax.f32 %v745_v63, 0.0 }
 0x3b9   :  { %v768_v13 = vpack.c.bf16 %v760_v7, %v759_v11 }
 0x3bc   :  { %v747_v47 = vpop.f32.mrf.mxu2 }
 0x3bd   :  { %v748_v59 = vadd.f32 %v747_v47, %v679_v52  ;;  %v194_v47 = vpop.permute.xlu1 %193 }
 0x3be   :  { %v363_v63 = vadd.f32 %v1591_v22, %v194_v47 }
 0x3bf   :  { %v761_v3 = vmax.f32 %v748_v59, 0.0 }
 0x3c4   :  { %v749_v48 = vpop.f32.mrf.mxu2 }
 0x3c5   :  { %v750_v57 = vadd.f32 %v749_v48, %v684_v55 }
 0x3c7   :  { %v762_v0 = vmax.f32 %v750_v57, 0.0 }
 0x3c9   :  { %v769_v8 = vpack.c.bf16 %v762_v0, %v761_v3 }
 0x3cc   :  { %v752_v51 = vpop.f32.mrf.mxu2 }
 0x3cd   :  { %v753_v54 = vadd.f32 %v752_v51, %v689_v50  ;;  %v189_v50 = vpop.permute.xlu1 %188 }
 0x3ce   :  { %v360_v52 = vadd.f32 %v1589_v21, %v189_v50 }
 0x3cf   :  { %v763_v60 = vmax.f32 %v753_v54, 0.0 }
 0x3d4   :  { %v754_v56 = vpop.f32.mrf.mxu2 }
 0x3d5   :  { %v755_v58 = vadd.f32 %v754_v56, %v694_v49  ;;  %v184_v49 = vpop.permute.xlu0 %183  ;;  %v199_v56 = vpop.permute.xlu2 %198 }
 0x3d6   :  { %v358_v51 = vadd.f32 %v1587_v20, %v184_v49  ;;  %v365_v0 = vadd.f32 %v1593_v23, %v199_v56  ;;  %v164_v22 = vpop.permute.xlu1 %163 }
 0x3d7   :  { %v764_v61 = vmax.f32 %v755_v58, 0.0 }
 0x3d9   :  { %v770_v1 = vpack.c.bf16 %v764_v61, %v763_v60  ;;  %v347_v61 = vpop.f32.mrf.mxu0 }
 0x3da   :  { %v348_v14 = vadd.f32 %v347_v61, %v164_v22 }
 0x3db   :  { %785 = vmatpush.bf16.msrb.mxu3 %v770_v1 }
 0x3dd   :  { %v174_v62 = vpop.permute.xlu2 %173  ;;  %v179_v2 = vpop.permute.xlu0 %178 }
 0x3de   :  { %v355_v21 = vadd.f32 %v1585_v19, %v179_v2 }
 0x3df   :  { %786 = vmatpush.bf16.msrb.mxu3 %v769_v8  ;;  %v353_v8 = vadd.f32 %v1583_v18, %v174_v62  ;;  %v1286_v18 = vld [vmem:[%s1702_s4 + $0x40] sm:$0xff] }
 0x3e1   :  { %v349_v7 = vpop.f32.mrf.mxu0 }
 0x3e3   :  { %787 = vmatpush.bf16.msrb.mxu3 %v768_v13 }
 0x3e5   :  { %v169_v11 = vpop.permute.xlu2 %168 }
 0x3e6   :  { %v350_v12 = vadd.f32 %v349_v7, %v169_v11 }
 0x3e7   :  { %788 = vmatpush.bf16.msrb.mxu3 %v767_v15 }
 0x3ea   :  { %1213 = vmatmul.msk.bf16.vlgmr.msrb.gmra.mxu3 %vm455_vm1, %v1211_v16 }
 0x46d   :  { %v790_v24 = vpop.f32.mrf.mxu3 }
 0x46e   :  { %v791_v25 = vadd.f32 %v790_v24, %v776_v17 }
 0x470   :  { %v794_v26 = vand.u32 2147483647, %v791_v25 }
 0x472   :  { %v795_v27 = vmul.f32 0.14476483, %v794_v26 }
 0x474   :  { %v796_v28 = vadd.f32 1.0, %v795_v27  ;;  %v1287_v27 = vld [vmem:[%s1702_s4 + $0x48] sm:$0xff] }
 0x475   :  { %v792_v29 = vpop.f32.mrf.mxu3 }
 0x476   :  { %1299 = vrcp.f32 %v796_v28  ;;  %v1288_v28 = vld [vmem:[%s1702_s4 + $0x50] sm:$0xff]  ;;  %v1289_v29 = vld [vmem:[%s1702_s4 + $0x58] sm:$0xff] }
 0x47c   :  { %v1300_v30 = vpop.eup %1299 }
 0x47d   :  { %v1640_v31 = vmul.f32 %v1300_v30, %v791_v25 }
 0x47f   :  { %v799_v33 = vmul.f32 1.442695, %v1640_v31 }
 0x481   :  { %1301 = vpow2.f32 %v799_v33 }
 0x487   :  { %v1302_v34 = vpop.eup %1301 }
 0x488   :  { %v802_v35 = vrot.slane %v1302_v34, 4 }
 0x48a   :  { %v804_v36 = vmul.f32 %v802_v35, %v1599_v37  ;;  %v1284_v37 = vld [vmem:[%s1704_s3 + $0x30] sm:$0xff] }
 0x48c   :  { %v1644_v38 = vadd.f32 %v804_v36, %v791_v25 }
 0x48e   :  { %v815_v39 = vpack.c.bf16 %v1644_v38, %v1644_v38 }
 0x490   :  { %v849_v40 = vsel %vm587_vm2, %v815_v39, 0 }
 0x491   :  { %858 = vmatpush.bf16.msrb.mxu1 %v849_v40  ;;  %v954_v40 = vpop.permute.xlu1 %953 }
 0x494   :  { %1230 = vmatmul.msk.bf16.vlgmr.msrb.gmra.mxu1 %vm574_vm3, %v1282_v4  ;;  %v949_v4 = vpop.permute.xlu0 %948 }
 0x4a4   :  { %1231 = vmatmul.msk.bf16.gmra.mxu1 %vm574_vm3, %v1283_v41 }
 0x4b4   :  { %1232 = vmatmul.msk.bf16.gmra.mxu1 %vm574_vm3, %v1284_v37  ;;  %v939_v37 = vpop.permute.xlu2 %938 }
 0x4c4   :  { %1233 = vmatmul.msk.bf16.gmra.mxu1 %vm574_vm3, %v1285_v42  ;;  %v929_v42 = vpop.permute.xlu1 %928 }
 0x511   :  { %v860_v43 = vpop.f32.mrf.mxu1 }
 0x512   :  { %v880_v16 = vadd.f32 %v860_v43, %v348_v14 }
 0x514   :  { %v888_v25 = vmax.f32 %v880_v16, 0.0 }
 0x519   :  { %v862_v44 = vpop.f32.mrf.mxu1 }
 0x51a   :  { %v881_v23 = vadd.f32 %v862_v44, %v350_v12  ;;  %v944_v44 = vpop.permute.xlu0 %943 }
 0x51c   :  { %v889_v24 = vmax.f32 %v881_v23, 0.0 }
 0x51e   :  { %v904_v26 = vpack.c.bf16 %v889_v24, %v888_v25 }
 0x521   :  { %v865_v45 = vpop.f32.mrf.mxu1 }
 0x522   :  { %v882_v13 = vadd.f32 %v865_v45, %v353_v8  ;;  %v919_v61 = vpop.permute.xlu0 %918 }
 0x524   :  { %v890_v17 = vmax.f32 %v882_v13, 0.0 }
 0x529   :  { %v867_v46 = vpop.f32.mrf.mxu1 }
 0x52a   :  { %v883_v9 = vadd.f32 %v867_v46, %v355_v21 }
 0x52c   :  { %v891_v15 = vmax.f32 %v883_v9, 0.0 }
 0x52e   :  { %v905_v19 = vpack.c.bf16 %v891_v15, %v890_v17  ;;  %v806_v17 = vadd.f32 %v1640_v31, %v1595_v32 }
 0x531   :  { %v870_v48 = vpop.f32.mrf.mxu1 }
 0x532   :  { %v884_v53 = vadd.f32 %v870_v48, %v358_v51  ;;  %v934_v51 = vpop.permute.xlu2 %933 }
 0x534   :  { %v892_v57 = vmax.f32 %v884_v53, 0.0 }
 0x539   :  { %v872_v54 = vpop.f32.mrf.mxu1 }
 0x53a   :  { %v885_v55 = vadd.f32 %v872_v54, %v360_v52  ;;  %v1036_v21 = vpop.permute.xlu2 %1035 }
 0x53c   :  { %v893_v58 = vmax.f32 %v885_v55, 0.0 }
 0x53e   :  { %v906_v59 = vpack.c.bf16 %v893_v58, %v892_v57  ;;  %v924_v57 = vpop.permute.xlu1 %923 }
 0x541   :  { %v875_v60 = vpop.f32.mrf.mxu1 }
 0x542   :  { %v886_v1 = vadd.f32 %v875_v60, %v363_v63 }
 0x544   :  { %v894_v5 = vmax.f32 %v886_v1, 0.0 }
 0x549   :  { %v877_v3 = vpop.f32.mrf.mxu1 }
 0x54a   :  { %v887_v20 = vadd.f32 %v877_v3, %v365_v0 }
 0x54c   :  { %v895_v6 = vmax.f32 %v887_v20, 0.0  ;;  %v1254_v20 = vld [vmem:[%s1703_s6 + $0x8] sm:$0xf] }
 0x54e   :  { %v907_v10 = vpack.c.bf16 %v895_v6, %v894_v5 }
 0x550   :  { %992 = vmatpush.bf16.msra.mxu3 %v907_v10 }
 0x554   :  { %993 = vmatpush.bf16.msra.mxu3 %v906_v59 }
 0x558   :  { %994 = vmatpush.bf16.msra.mxu3 %v905_v19 }
 0x55c   :  { %995 = vmatpush.bf16.msra.mxu3 %v904_v26 }
 0x55f   :  { %1250 = vmatmul.msk.bf16.vlgmr.msra.gmra.mxu3 %vm455_vm1, %v1286_v18 }
 0x56f   :  { %1251 = vmatmul.msk.bf16.gmra.mxu3 %vm455_vm1, %v1287_v27 }
 0x57f   :  { %1252 = vmatmul.msk.bf16.gmra.mxu3 %vm455_vm1, %v1288_v28 }
 0x58f   :  { %1253 = vmatmul.msk.bf16.gmra.mxu3 %vm455_vm1, %v1289_v29 }
 0x5e2   :  { %v997_v30 = vpop.f32.mrf.mxu3 }
 0x5e3   :  { %v998_v62 = vadd.f32 %v997_v30, %v919_v61 }
 0x5e5   :  { %v1017_v2 = vmax.f32 %v998_v62, 0.0 }
 0x5ea   :  { %v999_v33 = vpop.f32.mrf.mxu3 }
 0x5eb   :  { %v1000_v58 = vadd.f32 %v999_v33, %v924_v57 }
 0x5ed   :  { %v1018_v0 = vmax.f32 %v1000_v58, 0.0 }
 0x5ef   :  { %v1027_v3 = vpack.c.bf16 %v1018_v0, %v1017_v2 }
 0x5f2   :  { %v1002_v34 = vpop.f32.mrf.mxu3 }
 0x5f3   :  { %v1003_v55 = vadd.f32 %v1002_v34, %v929_v42 }
 0x5f5   :  { %v1019_v63 = vmax.f32 %v1003_v55, 0.0 }
 0x5fa   :  { %v1004_v35 = vpop.f32.mrf.mxu3 }
 0x5fb   :  { %v1005_v52 = vadd.f32 %v1004_v35, %v934_v51 }
 0x5fd   :  { %v1020_v59 = vmax.f32 %v1005_v52, 0.0 }
 0x5ff   :  { %v1028_v1 = vpack.c.bf16 %v1020_v59, %v1019_v63 }
 0x602   :  { %v1007_v36 = vpop.f32.mrf.mxu3 }
 0x603   :  { %v1008_v48 = vadd.f32 %v1007_v36, %v939_v37 }
 0x605   :  { %v1021_v56 = vmax.f32 %v1008_v48, 0.0 }
 0x60a   :  { %v1009_v39 = vpop.f32.mrf.mxu3 }
 0x60b   :  { %v1010_v46 = vadd.f32 %v1009_v39, %v944_v44 }
 0x60d   :  { %v1022_v53 = vmax.f32 %v1010_v46, 0.0 }
 0x60f   :  { %v1029_v60 = vpack.c.bf16 %v1022_v53, %v1021_v56 }
 0x612   :  { %v1012_v41 = vpop.f32.mrf.mxu3 }
 0x613   :  { %v1013_v43 = vadd.f32 %v1012_v41, %v949_v4 }
 0x615   :  { %v1023_v49 = vmax.f32 %v1013_v43, 0.0 }
 0x61a   :  { %v1014_v45 = vpop.f32.mrf.mxu3 }
 0x61b   :  { %v1015_v47 = vadd.f32 %v1014_v45, %v954_v40 }
 0x61d   :  { %v1024_v50 = vmax.f32 %v1015_v47, 0.0 }
 0x61f   :  { %v1030_v54 = vpack.c.bf16 %v1024_v50, %v1023_v49 }
 0x621   :  { %1045 = vmatpush.bf16.msrb.mxu2 %v1030_v54 }
 0x625   :  { %1046 = vmatpush.bf16.msrb.mxu2 %v1029_v60 }
 0x629   :  { %1047 = vmatpush.bf16.msrb.mxu2 %v1028_v1 }
 0x62d   :  { %1048 = vmatpush.bf16.msrb.mxu2 %v1027_v3 }
 0x630   :  { %1256 = vmatmul.msk.bf16.vlgmr.msrb.gmra.mxu2 %vm455_vm1, %v1254_v20 }
 0x6b3   :  { %v1050_v5 = vpop.f32.mrf.mxu2 }
 0x6b4   :  { %v1051_v6 = vadd.f32 %v1050_v5, %v1036_v21 }
 0x6b6   :  { %v1054_v7 = vand.u32 2147483647, %v1051_v6 }
 0x6b8   :  { %v1055_v8 = vmul.f32 0.14476483, %v1054_v7 }
 0x6ba   :  { %v1056_v9 = vadd.f32 1.0, %v1055_v8 }
 0x6bb   :  { %v1052_v10 = vpop.f32.mrf.mxu2 }
 0x6bc   :  { %1303 = vrcp.f32 %v1056_v9 }
 0x6c2   :  { %v1304_v11 = vpop.eup %1303 }
 0x6c3   :  { %v1058_v12 = vmul.f32 %v1304_v11, %v1051_v6 }
 0x6c5   :  { %v1059_v13 = vmul.f32 1.442695, %v1058_v12  ;;  %v1066_v19 = vadd.f32 %v1058_v12, %v806_v17 }
 0x6c7   :  { %1305 = vpow2.f32 %v1059_v13 }
 0x6cd   :  { %v1306_v22 = vpop.eup %1305 }
 0x6ce   :  { %v1062_v14 = vrot.slane %v1306_v22, 4 }
 0x6d0   :  { %v1064_v23 = vmul.f32 %v1062_v14, %v1644_v38 }
 0x6d2   :  { %v1065_v15 = vadd.f32 %v1064_v23, %v1051_v6 }
 0x6d4   :  { %v1067_v16 = vmul.f32 0.5, %v1065_v15 }
 0x6d6   :  { %v1068_v24 = vmul.f32 %v1067_v16, %v1065_v15 }
 0x6d8   :  { %v1070_v25 = vrot.slane %v1068_v24, 4 }
 0x6da   :  { %v1072_v26 = vsub.f32 %v1066_v19, %v1070_v25 }
 0x6dc   :  { %v1074_v18 = vrot.slane %v1072_v26, 4 }
 0x6de   :  { %v1077_v27 = vsel %vm1076_vm4, %v1074_v18, 0.0 }
 0x6df   :  { %v1078_v28 = vrot.slane %v1077_v27, 4 }
 0x6e1   :  { %v1079_v29 = vadd.f32 %v1078_v28, %v1077_v27 }
 0x6e3   :  { %v1080_v30 = vrot.slane %v1079_v29, 2 }
 0x6e5   :  { %v1081_v33 = vadd.f32 %v1080_v30, %v1079_v29 }
 0x6e7   :  { %v1082_v34 = vrot.slane %v1081_v33, 1 }
 0x6e9   :  { %v1083_v35 = vadd.f32 %v1082_v34, %v1081_v33 }
 0x6eb   :  { %v1257_v36 = vadd.f32 -3.675754, %v1083_v35 }
 0x6ed   :  { %1085 = vst [vmem:[%s1705_s8] sm:$0x1] %v1257_v36 }

</bundles_post_ra>
